<compile_context>
chip_gen: v7x
topology: tpu7x:2x2x1
jax: 0.10.0
libtpu: 0.0.40
codegen_flags: <defaults>
</compile_context>

<pallas_src>
import jax
import jax.numpy as jnp
from jax.experimental import pallas as pl
from jax.experimental.pallas import tpu as pltpu

# ---- static model / problem sizes (consistent with the module) ----
B = 2            # batch
L = 17           # sequence length (token ids)
E = 16           # embedding size (vector.shape[1])
C = 100          # conv output channels (= GRU input size)
H = 100          # GRU hidden size
NUM_LABELS = 2
VOCAB = 50
PAD = 2          # max conv padding -> single padded embedding buffer
LW = 16          # conv rows kept by the pool4 -> pool4 chain (floor mode)
NSHIFT = 4       # shifted windows needed (max conv kernel size)
CP = 128         # conv channels padded to lane width
HP = 128         # GRU hidden padded to lane width
KP = 128         # conv contraction dim padded (4*E = 64 -> 128)
T_GRU = 3        # GRU timesteps after the collapsed pooling


def cnn_gru_kernel(slab_ref, wc_ref, bc_ref, wgru_ref, bgru_ref,
                   wout_ref, bout_ref, out_ref):
    # ---- all three convs as one MXU push: (B*LW, KP) @ (KP, 3*CP) ----
    conv = jnp.dot(slab_ref[...], wc_ref[...],
                   preferred_element_type=jnp.float32) + bc_ref[...]     # (B*LW, 3*CP) f32

    # ---- pool4 -> concat -> pool4 == per-conv column max over the 16 kept rows ----
    seq = jnp.concatenate(
        [jnp.max(conv[b * LW:(b + 1) * LW, :], axis=0, keepdims=True) for b in range(B)],
        axis=0)                                                          # (B, 3*CP) f32; lanes t*CP.. = GRU input at step t

    wih = wgru_ref[0:HP, :]           # (HP, 3*HP) bf16
    whh = wgru_ref[HP:2 * HP, :]      # (HP, 3*HP) bf16
    bih = bgru_ref[0:1, :]            # (1, 3*HP) f32
    bhh = bgru_ref[1:2, :]            # (1, 3*HP) f32

    # ---- GRU over 3 timesteps, batch-fused (h: (B, HP)); PyTorch gate order r, z, n ----
    h = jnp.zeros((B, HP), jnp.float32)
    hmax = jnp.full((B, HP), -jnp.inf, jnp.float32)
    for t in range(T_GRU):
        x_t = seq[:, t * CP:(t + 1) * CP].astype(jnp.bfloat16)           # lane-aligned slice
        gi = jnp.dot(x_t, wih, preferred_element_type=jnp.float32) + bih
        gh = jnp.dot(h.astype(jnp.bfloat16), whh,
                     preferred_element_type=jnp.float32) + bhh
        r = jax.nn.sigmoid(gi[:, 0:HP] + gh[:, 0:HP])
        z = jax.nn.sigmoid(gi[:, HP:2 * HP] + gh[:, HP:2 * HP])
        n = jnp.tanh(gi[:, 2 * HP:] + r * gh[:, 2 * HP:])
        h = (1.0 - z) * n + z * h
        hmax = jnp.maximum(hmax, h)                                      # global max pooling over time

    # ---- output linear, lane-padded to 128 so the store is lane-dense ----
    out_ref[...] = jnp.dot(hmax.astype(jnp.bfloat16), wout_ref[...],
                           preferred_element_type=jnp.float32) + bout_ref[...]


def _pack_params(params):
    """Re-layout weights into lane-aligned, bf16 MXU slabs (done once, outside the kernel)."""
    f32 = jnp.float32

    # Fused conv weight: shift s contributes conv-k slice dk = s - s0 into that conv's segment.
    wc = jnp.zeros((KP, 3 * CP), f32)
    bc = jnp.zeros((1, 3 * CP), f32)
    for seg, (wname, bname, s0) in enumerate(
            [("conv1_w", "conv1_b", 2),      # k=2, pad=0 -> shifts 2,3
             ("conv2_w", "conv2_b", 1),      # k=3, pad=1 -> shifts 1,2,3
             ("conv3_w", "conv3_b", 0)]):    # k=4, pad=2 -> shifts 0,1,2,3
        w = params[wname]                     # (C, E, K)
        for dk in range(w.shape[2]):
            s = s0 + dk
            wc = wc.at[s * E:(s + 1) * E, seg * CP:seg * CP + C].set(w[:, :, dk].T)
        bc = bc.at[0, seg * CP:seg * CP + C].set(params[bname])

    # GRU weights: rows 0:HP = W_ih^T (gate g at lanes g*HP), rows HP:2HP = W_hh^T.
    wgru = jnp.zeros((2 * HP, 3 * HP), f32)
    bgru = jnp.zeros((2, 3 * HP), f32)
    for g in range(3):
        wgru = wgru.at[0:C, g * HP:g * HP + H].set(params["gru_wih"][g * H:(g + 1) * H, :].T)
        wgru = wgru.at[HP:HP + H, g * HP:g * HP + H].set(params["gru_whh"][g * H:(g + 1) * H, :].T)
        bgru = bgru.at[0, g * HP:g * HP + H].set(params["gru_bih"][g * H:(g + 1) * H])
        bgru = bgru.at[1, g * HP:g * HP + H].set(params["gru_bhh"][g * H:(g + 1) * H])

    # Output linear padded to (HP, HP); only the first NUM_LABELS columns are real.
    wout = jnp.zeros((HP, HP), f32).at[0:H, 0:NUM_LABELS].set(params["out_w"].T)
    bout = jnp.zeros((1, HP), f32).at[0, 0:NUM_LABELS].set(params["out_b"])

    bf16 = jnp.bfloat16
    return wc.astype(bf16), bc, wgru.astype(bf16), bgru, wout.astype(bf16), bout


@jax.jit
def cnn_gru_forward(x_tokens, params):
    # Pooling-collapse validity for these static sizes (guard per review).
    n1, n2, n3 = (L - 1) // 4, L // 4, (L + 1) // 4
    assert (n1, n2, n3) == (4, 4, 4) and (n1 + n2 + n3) // 4 == T_GRU

    # ---- glue (layout plumbing): embedding lookup, zero pad, shifted-window slab ----
    emb = jnp.take(params["embedding"], x_tokens, axis=0)                 # (B, L, E)
    emb_pad = jnp.pad(emb, ((0, 0), (PAD, PAD), (0, 0)))                  # (B, L+2*PAD, E)
    slab = jnp.concatenate([emb_pad[:, s:s + LW, :] for s in range(NSHIFT)], axis=-1)  # (B, LW, 4E)
    slab = slab.reshape(B * LW, NSHIFT * E)
    slab = jnp.pad(slab, ((0, 0), (0, KP - NSHIFT * E))).astype(jnp.bfloat16)          # (B*LW, KP)

    wc, bc, wgru, bgru, wout, bout = _pack_params(params)

    vmem = pl.BlockSpec(memory_space=pltpu.MemorySpace.VMEM)
    out = pl.pallas_call(
        cnn_gru_kernel,
        out_shape=jax.ShapeDtypeStruct((B, HP), jnp.float32),
        in_specs=[vmem] * 7,
        out_specs=vmem,
    )(slab, wc, bc, wgru, bgru, wout, bout)
    return out[:, :NUM_LABELS]


def reference_forward(x_tokens, params):
    """Pure-JAX reference mirroring the PyTorch forward (no labels branch)."""
    emb = jnp.take(params["embedding"], x_tokens, axis=0)                 # (B, L, E)
    x_ncl = jnp.transpose(emb, (0, 2, 1))                                 # (B, E, L)

    def conv1d(x, w, b, pad):
        out = jax.lax.conv_general_dilated(
            x, w, window_strides=(1,), padding=[(pad, pad)],
            dimension_numbers=("NCH", "OIH", "NCH"))
        return out + b[None, :, None]

    def maxpool(x):
        p = x.shape[-1] // 4
        return jnp.max(x[..., :4 * p].reshape(x.shape[0], x.shape[1], p, 4), axis=-1)

    c1 = maxpool(conv1d(x_ncl, params["conv1_w"], params["conv1_b"], 0))
    c2 = maxpool(conv1d(x_ncl, params["conv2_w"], params["conv2_b"], 1))
    c3 = maxpool(conv1d(x_ncl, params["conv3_w"], params["conv3_b"], 2))
    cat = maxpool(jnp.concatenate([c1, c2, c3], axis=2))                  # (B, C, T2)
    seq = jnp.transpose(cat, (0, 2, 1))                                   # (B, T2, C)

    wih, whh = params["gru_wih"], params["gru_whh"]
    bih, bhh = params["gru_bih"], params["gru_bhh"]
    h = jnp.zeros((seq.shape[0], H), jnp.float32)
    hmax = jnp.full((seq.shape[0], H), -jnp.inf, jnp.float32)
    for t in range(seq.shape[1]):
        gi = seq[:, t, :] @ wih.T + bih
        gh = h @ whh.T + bhh
        r = jax.nn.sigmoid(gi[:, :H] + gh[:, :H])
        z = jax.nn.sigmoid(gi[:, H:2 * H] + gh[:, H:2 * H])
        n = jnp.tanh(gi[:, 2 * H:] + r * gh[:, 2 * H:])
        h = (1.0 - z) * n + z * h
        hmax = jnp.maximum(hmax, h)
    return hmax @ params["out_w"].T + params["out_b"]


def make_params(key):
    ks = jax.random.split(key, 13)
    p = {
        "embedding": jax.random.normal(ks[0], (VOCAB, E), jnp.float32) * 0.5,
        "conv1_w": jax.random.normal(ks[1], (C, E, 2), jnp.float32) * 0.1,
        "conv1_b": jax.random.normal(ks[2], (C,), jnp.float32) * 0.1,
        "conv2_w": jax.random.normal(ks[3], (C, E, 3), jnp.float32) * 0.1,
        "conv2_b": jax.random.normal(ks[4], (C,), jnp.float32) * 0.1,
        "conv3_w": jax.random.normal(ks[5], (C, E, 4), jnp.float32) * 0.1,
        "conv3_b": jax.random.normal(ks[6], (C,), jnp.float32) * 0.1,
        "gru_wih": jax.random.normal(ks[7], (3 * H, H), jnp.float32) * 0.1,
        "gru_whh": jax.random.normal(ks[8], (3 * H, H), jnp.float32) * 0.1,
        "gru_bih": jax.random.normal(ks[9], (3 * H,), jnp.float32) * 0.1,
        "gru_bhh": jax.random.normal(ks[10], (3 * H,), jnp.float32) * 0.1,
        "out_w": jax.random.normal(ks[11], (NUM_LABELS, H), jnp.float32) * 0.1,
        "out_b": jnp.zeros((NUM_LABELS,), jnp.float32),
    }
    return p, ks[12]


if __name__ == "__main__":
    key = jax.random.PRNGKey(0)
    params, key = make_params(key)
    x_tokens = jax.random.randint(key, (B, L), 0, VOCAB, dtype=jnp.int32)

    out = jax.block_until_ready(cnn_gru_forward(x_tokens, params))
    ref = jax.block_until_ready(reference_forward(x_tokens, params))

    assert out.shape == (B, NUM_LABELS)
    assert jnp.allclose(out, ref, atol=2e-2, rtol=2e-2), (out, ref)

    print("KERNEL_OK")
</pallas_src>

<mosaic_0001>
module attributes {stable_mosaic.version = 11 : i64} {
  func.func @cnn_gru_kernel(%arg0: memref<32x128xbf16, #tpu.memory_space<vmem>>, %arg1: memref<128x384xbf16, #tpu.memory_space<vmem>>, %arg2: memref<1x384xf32, #tpu.memory_space<vmem>>, %arg3: memref<256x384xbf16, #tpu.memory_space<vmem>>, %arg4: memref<2x384xf32, #tpu.memory_space<vmem>>, %arg5: memref<128x128xbf16, #tpu.memory_space<vmem>>, %arg6: memref<1x128xf32, #tpu.memory_space<vmem>>, %arg7: memref<2x128xf32, #tpu.memory_space<vmem>>) attributes {dimension_semantics = [], scalar_prefetch = 0 : i64, scratch_operands = 0 : i64, tpu.core_type = #tpu.core_type<tc>} {
    %c0 = arith.constant 0 : index
    %c0_0 = arith.constant 0 : index
    %0 = vector.load %arg0[%c0, %c0_0] : memref<32x128xbf16, #tpu.memory_space<vmem>>, vector<32x128xbf16>
    %c0_1 = arith.constant 0 : index
    %c0_2 = arith.constant 0 : index
    %1 = vector.load %arg1[%c0_1, %c0_2] : memref<128x384xbf16, #tpu.memory_space<vmem>>, vector<128x384xbf16>
    %cst = arith.constant dense<0.000000e+00> : vector<32x384xf32>
    %2 = tpu.matmul %0, %1, %cst {dimension_numbers = #tpu.dot_dimension_numbers<[1], [0], [0], [1], [0, 0, 1, 1], [], []>} : vector<32x128xbf16>, vector<128x384xbf16>, vector<32x384xf32> -> vector<32x384xf32>
    %c0_3 = arith.constant 0 : index
    %c0_4 = arith.constant 0 : index
    %3 = vector.load %arg2[%c0_3, %c0_4] : memref<1x384xf32, #tpu.memory_space<vmem>>, vector<1x384xf32>
    %4 = vector.broadcast %3 : vector<1x384xf32> to vector<32x384xf32>
    %5 = arith.addf %2, %4 : vector<32x384xf32>
    %6 = vector.extract_strided_slice %5 {offsets = [0, 0], sizes = [16, 384], strides = [1, 1]} : vector<32x384xf32> to vector<16x384xf32>
    %cst_5 = arith.constant dense<0xFF800000> : vector<384xf32>
    %7 = vector.multi_reduction <maximumf>, %6, %cst_5 [0] : vector<16x384xf32> to vector<384xf32>
    %8 = vector.shape_cast %7 : vector<384xf32> to vector<1x384xf32>
    %9 = vector.extract_strided_slice %5 {offsets = [16, 0], sizes = [16, 384], strides = [1, 1]} : vector<32x384xf32> to vector<16x384xf32>
    %cst_6 = arith.constant dense<0xFF800000> : vector<384xf32>
    %10 = vector.multi_reduction <maximumf>, %9, %cst_6 [0] : vector<16x384xf32> to vector<384xf32>
    %11 = vector.shape_cast %10 : vector<384xf32> to vector<1x384xf32>
    %12 = tpu.concatenate %8, %11 in 0 : vector<1x384xf32>, vector<1x384xf32> -> vector<2x384xf32>
    %c0_7 = arith.constant 0 : index
    %c0_8 = arith.constant 0 : index
    %13 = vector.load %arg3[%c0_7, %c0_8] : memref<256x384xbf16, #tpu.memory_space<vmem>>, vector<128x384xbf16>
    %c128 = arith.constant 128 : index
    %c0_9 = arith.constant 0 : index
    %14 = vector.load %arg3[%c128, %c0_9] : memref<256x384xbf16, #tpu.memory_space<vmem>>, vector<128x384xbf16>
    %c0_10 = arith.constant 0 : index
    %c0_11 = arith.constant 0 : index
    %15 = vector.load %arg4[%c0_10, %c0_11] : memref<2x384xf32, #tpu.memory_space<vmem>>, vector<1x384xf32>
    %c1 = arith.constant 1 : index
    %c0_12 = arith.constant 0 : index
    %16 = vector.load %arg4[%c1, %c0_12] : memref<2x384xf32, #tpu.memory_space<vmem>>, vector<1x384xf32>
    %cst_13 = arith.constant 0.000000e+00 : f32
    %17 = vector.broadcast %cst_13 : f32 to vector<2x128xf32>
    %cst_14 = arith.constant 0xFF800000 : f32
    %18 = vector.broadcast %cst_14 : f32 to vector<2x128xf32>
    %19 = vector.extract_strided_slice %12 {offsets = [0, 0], sizes = [2, 128], strides = [1, 1]} : vector<2x384xf32> to vector<2x128xf32>
    %20 = arith.truncf %19 : vector<2x128xf32> to vector<2x128xbf16>
    %cst_15 = arith.constant dense<0.000000e+00> : vector<2x384xf32>
    %21 = tpu.matmul %20, %13, %cst_15 {dimension_numbers = #tpu.dot_dimension_numbers<[1], [0], [0], [1], [0, 0, 1, 1], [], []>} : vector<2x128xbf16>, vector<128x384xbf16>, vector<2x384xf32> -> vector<2x384xf32>
    %22 = vector.broadcast %15 : vector<1x384xf32> to vector<2x384xf32>
    %23 = arith.addf %21, %22 : vector<2x384xf32>
    %24 = arith.truncf %17 : vector<2x128xf32> to vector<2x128xbf16>
    %cst_16 = arith.constant dense<0.000000e+00> : vector<2x384xf32>
    %25 = tpu.matmul %24, %14, %cst_16 {dimension_numbers = #tpu.dot_dimension_numbers<[1], [0], [0], [1], [0, 0, 1, 1], [], []>} : vector<2x128xbf16>, vector<128x384xbf16>, vector<2x384xf32> -> vector<2x384xf32>
    %26 = vector.broadcast %16 : vector<1x384xf32> to vector<2x384xf32>
    %27 = arith.addf %25, %26 : vector<2x384xf32>
    %28 = vector.extract_strided_slice %23 {offsets = [0, 0], sizes = [2, 128], strides = [1, 1]} : vector<2x384xf32> to vector<2x128xf32>
    %29 = vector.extract_strided_slice %27 {offsets = [0, 0], sizes = [2, 128], strides = [1, 1]} : vector<2x384xf32> to vector<2x128xf32>
    %30 = arith.addf %28, %29 : vector<2x128xf32>
    %31 = arith.negf %30 : vector<2x128xf32>
    %32 = math.exp %31 : vector<2x128xf32>
    %cst_17 = arith.constant 1.000000e+00 : f32
    %33 = vector.broadcast %cst_17 : f32 to vector<2x128xf32>
    %34 = arith.addf %33, %32 : vector<2x128xf32>
    %35 = arith.divf %33, %34 : vector<2x128xf32>
    %36 = vector.extract_strided_slice %23 {offsets = [0, 128], sizes = [2, 128], strides = [1, 1]} : vector<2x384xf32> to vector<2x128xf32>
    %37 = vector.extract_strided_slice %27 {offsets = [0, 128], sizes = [2, 128], strides = [1, 1]} : vector<2x384xf32> to vector<2x128xf32>
    %38 = arith.addf %36, %37 : vector<2x128xf32>
    %39 = arith.negf %38 : vector<2x128xf32>
    %40 = math.exp %39 : vector<2x128xf32>
    %cst_18 = arith.constant 1.000000e+00 : f32
    %41 = vector.broadcast %cst_18 : f32 to vector<2x128xf32>
    %42 = arith.addf %41, %40 : vector<2x128xf32>
    %43 = arith.divf %41, %42 : vector<2x128xf32>
    %44 = vector.extract_strided_slice %23 {offsets = [0, 256], sizes = [2, 128], strides = [1, 1]} : vector<2x384xf32> to vector<2x128xf32>
    %45 = vector.extract_strided_slice %27 {offsets = [0, 256], sizes = [2, 128], strides = [1, 1]} : vector<2x384xf32> to vector<2x128xf32>
    %46 = arith.mulf %35, %45 : vector<2x128xf32>
    %47 = arith.addf %44, %46 : vector<2x128xf32>
    %48 = math.tanh %47 : vector<2x128xf32>
    %cst_19 = arith.constant 1.000000e+00 : f32
    %49 = vector.broadcast %cst_19 : f32 to vector<2x128xf32>
    %50 = arith.subf %49, %43 : vector<2x128xf32>
    %51 = arith.mulf %50, %48 : vector<2x128xf32>
    %52 = arith.mulf %43, %17 : vector<2x128xf32>
    %53 = arith.addf %51, %52 : vector<2x128xf32>
    %54 = arith.maximumf %18, %53 : vector<2x128xf32>
    %55 = vector.extract_strided_slice %12 {offsets = [0, 128], sizes = [2, 128], strides = [1, 1]} : vector<2x384xf32> to vector<2x128xf32>
    %56 = arith.truncf %55 : vector<2x128xf32> to vector<2x128xbf16>
    %cst_20 = arith.constant dense<0.000000e+00> : vector<2x384xf32>
    %57 = tpu.matmul %56, %13, %cst_20 {dimension_numbers = #tpu.dot_dimension_numbers<[1], [0], [0], [1], [0, 0, 1, 1], [], []>} : vector<2x128xbf16>, vector<128x384xbf16>, vector<2x384xf32> -> vector<2x384xf32>
    %58 = vector.broadcast %15 : vector<1x384xf32> to vector<2x384xf32>
    %59 = arith.addf %57, %58 : vector<2x384xf32>
    %60 = arith.truncf %53 : vector<2x128xf32> to vector<2x128xbf16>
    %cst_21 = arith.constant dense<0.000000e+00> : vector<2x384xf32>
    %61 = tpu.matmul %60, %14, %cst_21 {dimension_numbers = #tpu.dot_dimension_numbers<[1], [0], [0], [1], [0, 0, 1, 1], [], []>} : vector<2x128xbf16>, vector<128x384xbf16>, vector<2x384xf32> -> vector<2x384xf32>
    %62 = vector.broadcast %16 : vector<1x384xf32> to vector<2x384xf32>
    %63 = arith.addf %61, %62 : vector<2x384xf32>
    %64 = vector.extract_strided_slice %59 {offsets = [0, 0], sizes = [2, 128], strides = [1, 1]} : vector<2x384xf32> to vector<2x128xf32>
    %65 = vector.extract_strided_slice %63 {offsets = [0, 0], sizes = [2, 128], strides = [1, 1]} : vector<2x384xf32> to vector<2x128xf32>
    %66 = arith.addf %64, %65 : vector<2x128xf32>
    %67 = arith.negf %66 : vector<2x128xf32>
    %68 = math.exp %67 : vector<2x128xf32>
    %cst_22 = arith.constant 1.000000e+00 : f32
    %69 = vector.broadcast %cst_22 : f32 to vector<2x128xf32>
    %70 = arith.addf %69, %68 : vector<2x128xf32>
    %71 = arith.divf %69, %70 : vector<2x128xf32>
    %72 = vector.extract_strided_slice %59 {offsets = [0, 128], sizes = [2, 128], strides = [1, 1]} : vector<2x384xf32> to vector<2x128xf32>
    %73 = vector.extract_strided_slice %63 {offsets = [0, 128], sizes = [2, 128], strides = [1, 1]} : vector<2x384xf32> to vector<2x128xf32>
    %74 = arith.addf %72, %73 : vector<2x128xf32>
    %75 = arith.negf %74 : vector<2x128xf32>
    %76 = math.exp %75 : vector<2x128xf32>
    %cst_23 = arith.constant 1.000000e+00 : f32
    %77 = vector.broadcast %cst_23 : f32 to vector<2x128xf32>
    %78 = arith.addf %77, %76 : vector<2x128xf32>
    %79 = arith.divf %77, %78 : vector<2x128xf32>
    %80 = vector.extract_strided_slice %59 {offsets = [0, 256], sizes = [2, 128], strides = [1, 1]} : vector<2x384xf32> to vector<2x128xf32>
    %81 = vector.extract_strided_slice %63 {offsets = [0, 256], sizes = [2, 128], strides = [1, 1]} : vector<2x384xf32> to vector<2x128xf32>
    %82 = arith.mulf %71, %81 : vector<2x128xf32>
    %83 = arith.addf %80, %82 : vector<2x128xf32>
    %84 = math.tanh %83 : vector<2x128xf32>
    %cst_24 = arith.constant 1.000000e+00 : f32
    %85 = vector.broadcast %cst_24 : f32 to vector<2x128xf32>
    %86 = arith.subf %85, %79 : vector<2x128xf32>
    %87 = arith.mulf %86, %84 : vector<2x128xf32>
    %88 = arith.mulf %79, %53 : vector<2x128xf32>
    %89 = arith.addf %87, %88 : vector<2x128xf32>
    %90 = arith.maximumf %54, %89 : vector<2x128xf32>
    %91 = vector.extract_strided_slice %12 {offsets = [0, 256], sizes = [2, 128], strides = [1, 1]} : vector<2x384xf32> to vector<2x128xf32>
    %92 = arith.truncf %91 : vector<2x128xf32> to vector<2x128xbf16>
    %cst_25 = arith.constant dense<0.000000e+00> : vector<2x384xf32>
    %93 = tpu.matmul %92, %13, %cst_25 {dimension_numbers = #tpu.dot_dimension_numbers<[1], [0], [0], [1], [0, 0, 1, 1], [], []>} : vector<2x128xbf16>, vector<128x384xbf16>, vector<2x384xf32> -> vector<2x384xf32>
    %94 = vector.broadcast %15 : vector<1x384xf32> to vector<2x384xf32>
    %95 = arith.addf %93, %94 : vector<2x384xf32>
    %96 = arith.truncf %89 : vector<2x128xf32> to vector<2x128xbf16>
    %cst_26 = arith.constant dense<0.000000e+00> : vector<2x384xf32>
    %97 = tpu.matmul %96, %14, %cst_26 {dimension_numbers = #tpu.dot_dimension_numbers<[1], [0], [0], [1], [0, 0, 1, 1], [], []>} : vector<2x128xbf16>, vector<128x384xbf16>, vector<2x384xf32> -> vector<2x384xf32>
    %98 = vector.broadcast %16 : vector<1x384xf32> to vector<2x384xf32>
    %99 = arith.addf %97, %98 : vector<2x384xf32>
    %100 = vector.extract_strided_slice %95 {offsets = [0, 0], sizes = [2, 128], strides = [1, 1]} : vector<2x384xf32> to vector<2x128xf32>
    %101 = vector.extract_strided_slice %99 {offsets = [0, 0], sizes = [2, 128], strides = [1, 1]} : vector<2x384xf32> to vector<2x128xf32>
    %102 = arith.addf %100, %101 : vector<2x128xf32>
    %103 = arith.negf %102 : vector<2x128xf32>
    %104 = math.exp %103 : vector<2x128xf32>
    %cst_27 = arith.constant 1.000000e+00 : f32
    %105 = vector.broadcast %cst_27 : f32 to vector<2x128xf32>
    %106 = arith.addf %105, %104 : vector<2x128xf32>
    %107 = arith.divf %105, %106 : vector<2x128xf32>
    %108 = vector.extract_strided_slice %95 {offsets = [0, 128], sizes = [2, 128], strides = [1, 1]} : vector<2x384xf32> to vector<2x128xf32>
    %109 = vector.extract_strided_slice %99 {offsets = [0, 128], sizes = [2, 128], strides = [1, 1]} : vector<2x384xf32> to vector<2x128xf32>
    %110 = arith.addf %108, %109 : vector<2x128xf32>
    %111 = arith.negf %110 : vector<2x128xf32>
    %112 = math.exp %111 : vector<2x128xf32>
    %cst_28 = arith.constant 1.000000e+00 : f32
    %113 = vector.broadcast %cst_28 : f32 to vector<2x128xf32>
    %114 = arith.addf %113, %112 : vector<2x128xf32>
    %115 = arith.divf %113, %114 : vector<2x128xf32>
    %116 = vector.extract_strided_slice %95 {offsets = [0, 256], sizes = [2, 128], strides = [1, 1]} : vector<2x384xf32> to vector<2x128xf32>
    %117 = vector.extract_strided_slice %99 {offsets = [0, 256], sizes = [2, 128], strides = [1, 1]} : vector<2x384xf32> to vector<2x128xf32>
    %118 = arith.mulf %107, %117 : vector<2x128xf32>
    %119 = arith.addf %116, %118 : vector<2x128xf32>
    %120 = math.tanh %119 : vector<2x128xf32>
    %cst_29 = arith.constant 1.000000e+00 : f32
    %121 = vector.broadcast %cst_29 : f32 to vector<2x128xf32>
    %122 = arith.subf %121, %115 : vector<2x128xf32>
    %123 = arith.mulf %122, %120 : vector<2x128xf32>
    %124 = arith.mulf %115, %89 : vector<2x128xf32>
    %125 = arith.addf %123, %124 : vector<2x128xf32>
    %126 = arith.maximumf %90, %125 : vector<2x128xf32>
    %127 = arith.truncf %126 : vector<2x128xf32> to vector<2x128xbf16>
    %c0_30 = arith.constant 0 : index
    %c0_31 = arith.constant 0 : index
    %128 = vector.load %arg5[%c0_30, %c0_31] : memref<128x128xbf16, #tpu.memory_space<vmem>>, vector<128x128xbf16>
    %cst_32 = arith.constant dense<0.000000e+00> : vector<2x128xf32>
    %129 = tpu.matmul %127, %128, %cst_32 {dimension_numbers = #tpu.dot_dimension_numbers<[1], [0], [0], [1], [0, 0, 1, 1], [], []>} : vector<2x128xbf16>, vector<128x128xbf16>, vector<2x128xf32> -> vector<2x128xf32>
    %c0_33 = arith.constant 0 : index
    %c0_34 = arith.constant 0 : index
    %130 = vector.load %arg6[%c0_33, %c0_34] : memref<1x128xf32, #tpu.memory_space<vmem>>, vector<1x128xf32>
    %131 = vector.broadcast %130 : vector<1x128xf32> to vector<2x128xf32>
    %132 = arith.addf %129, %131 : vector<2x128xf32>
    %c0_35 = arith.constant 0 : index
    %c0_36 = arith.constant 0 : index
    %133 = vector.load %arg7[%c0_35, %c0_36] : memref<2x128xf32, #tpu.memory_space<vmem>>, vector<2x128xf32>
    tpu.vector_store %arg7[%c0_35, %c0_36], %132 {strides = array<i32>} : memref<2x128xf32, #tpu.memory_space<vmem>>, vector<2x128xf32>,
    return
  }
}

</mosaic_0001>

<bundles_post_ra>
// kernel: cnn_gru_forward.1
= control target key start
LH: loop header
LB: loop body
LE: loop exit
PB: predicated region body
PF: predicated region fallthrough
CT: control target
= control target key end

     0   :  { %v2623_v2 = vmov 0   ;;  %v2625_v30 = vmov 0.0   ;;  %s2615_s0 = inlined_call_operand.vmem [shape: bf16[32,128], index: 0, kind: input, shape index: {}]   ;;  %s2616_s1 = inlined_call_operand.vmem [shape: bf16[128,384], index: 1, kind: input, shape index: {}]   ;;  %s2617_s2 = inlined_call_operand.vmem [shape: f32[1,384], index: 2, kind: input, shape index: {}]   ;;  %s2618_s3 = inlined_call_operand.vmem [shape: bf16[256,384], index: 3, kind: input, shape index: {}]   ;;  %s2619_s4 = inlined_call_operand.vmem [shape: f32[2,384], index: 4, kind: input, shape index: {}]   ;;  %s2620_s5 = inlined_call_operand.vmem [shape: bf16[128,128], index: 5, kind: input, shape index: {}]   ;;  %s2621_s6 = inlined_call_operand.vmem [shape: f32[1,128], index: 6, kind: input, shape index: {}]   ;;  %s2622_s7 = inlined_call_operand.hbm [shape: f32[2,128], index: 7, kind: output, shape index: {}]  }
   0x1   :  { %v1758_v0 = vld [vmem:[%s2616_s1 + $0x4] ss:$12 sps:$4 sm:$0xff]   ;;  %v1760_v1 = vld [vmem:[%s2616_s1] ss:$12 sps:$4 sm:$0xff]   ;;  %253 = vmatprep.mubr.bf16.mxu0 %v2623_v2  ;;  %v1761_v3 = vld [vmem:[%s2616_s1 + $0x1c] ss:$12 sps:$4 sm:$0xff]  }
   0x2   :  { %221 = vmatprep.subr.bf16.mxu0 %v1758_v0  ;;  %v1763_v4 = vld [vmem:[%s2616_s1 + $0x18] ss:$12 sps:$4 sm:$0xff]   ;;  %v1764_v5 = vld [vmem:[%s2616_s1 + $0x34] ss:$12 sps:$4 sm:$0xff]   ;;  %v1766_v6 = vld [vmem:[%s2616_s1 + $0x30] ss:$12 sps:$4 sm:$0xff]  }
   0x3   :  { %222 = vmatpush1.bf16.msra.mxu0 %v1760_v1  ;;  %v1767_v7 = vld [vmem:[%s2616_s1 + $0x4c] ss:$12 sps:$4 sm:$0xff]   ;;  %v1769_v8 = vld [vmem:[%s2616_s1 + $0x48] ss:$12 sps:$4 sm:$0xff]   ;;  %v1782_v9 = vld [vmem:[%s2615_s0] sm:$0xff]  }
   0x4   :  { %223 = vmatprep.subr.bf16.mxu0 %v1761_v3  ;;  %v1770_v10 = vld [vmem:[%s2616_s1 + $0x64] ss:$12 sps:$4 sm:$0xff]   ;;  %v1784_v11 = vld [vmem:[%s2616_s1 + $0x8] ss:$12 sps:$4 sm:$0xff]   ;;  %1586 = vmatprep.mubr.bf16.mxu1 %v1782_v9  ;;  %v1785_v12 = vld [vmem:[%s2616_s1 + $0x20] ss:$12 sps:$4 sm:$0xff]  }
   0x5   :  { %v1772_v13 = vld [vmem:[%s2616_s1 + $0x60] ss:$12 sps:$4 sm:$0xff]   ;;  %1570 = vmatprep.subr.bf16.mxu1 %v1784_v11  ;;  %v1773_v14 = vld [vmem:[%s2616_s1 + $0x7c] ss:$12 sps:$4 sm:$0xff]   ;;  %v1786_v15 = vld [vmem:[%s2616_s1 + $0x38] ss:$12 sps:$4 sm:$0xff]  }
   0x6   :  { %1571 = vmatpush3.bf16.msra.mxu1 %v1784_v11  ;;  %v1775_v16 = vld [vmem:[%s2616_s1 + $0x78] ss:$12 sps:$4 sm:$0xff]   ;;  %v1776_v17 = vld [vmem:[%s2616_s1 + $0x94] ss:$12 sps:$4 sm:$0xff]   ;;  %v1778_v18 = vld [vmem:[%s2616_s1 + $0x90] ss:$12 sps:$4 sm:$0xff]  }
   0x7   :  { %224 = vmatpush1.bf16.msra.mxu0 %v1763_v4  ;;  %1572 = vmatprep.subr.bf16.mxu1 %v1785_v12  ;;  %v1787_v19 = vld [vmem:[%s2616_s1 + $0x50] ss:$12 sps:$4 sm:$0xff]   ;;  %v1779_v20 = vld [vmem:[%s2616_s1 + $0xac] ss:$12 sps:$4 sm:$0xff]   ;;  %v1788_v21 = vld [vmem:[%s2616_s1 + $0x68] ss:$12 sps:$4 sm:$0xff]  }
   0x8   :  { %225 = vmatprep.subr.bf16.mxu0 %v1764_v5  ;;  %v1781_v22 = vld [vmem:[%s2616_s1 + $0xa8] ss:$12 sps:$4 sm:$0xff]   ;;  %v2032_v23 = vld [vmem:[%s2618_s3 + $0x4] ss:$12 sps:$4 sm:$0xff]   ;;  %v1789_v24 = vld [vmem:[%s2616_s1 + $0x80] ss:$12 sps:$4 sm:$0xff]  }
   0x9   :  { %v2040_v25 = vld [vmem:[%s2618_s3] ss:$12 sps:$4 sm:$0xff]   ;;  %v1790_v26 = vld [vmem:[%s2616_s1 + $0x98] ss:$12 sps:$4 sm:$0xff]   ;;  %v1791_v27 = vld [vmem:[%s2616_s1 + $0xb0] ss:$12 sps:$4 sm:$0xff]  }
   0xa   :  { %1573 = vmatpush3.bf16.msra.mxu1 %v1785_v12  ;;  %v1783_v28 = vld [vmem:[%s2615_s0 + $0x8] sm:$0xff]  }
   0xb   :  { %226 = vmatpush1.bf16.msra.mxu0 %v1766_v6  ;;  %1574 = vmatprep.subr.bf16.mxu1 %v1786_v15  ;;  %v2057_v29 = vld [vmem:[%s2618_s3 + $0x8] ss:$12 sps:$4 sm:$0xff]  }
   0xc   :  { %227 = vmatprep.subr.bf16.mxu0 %v1767_v7 }
   0xe   :  { %1575 = vmatpush3.bf16.msra.mxu1 %v1786_v15 }
   0xf   :  { %228 = vmatpush1.bf16.msra.mxu0 %v1769_v8  ;;  %1576 = vmatprep.subr.bf16.mxu1 %v1787_v19 }
  0x10   :  { %229 = vmatprep.subr.bf16.mxu0 %v1770_v10 }
  0x12   :  { %1577 = vmatpush3.bf16.msra.mxu1 %v1787_v19 }
  0x13   :  { %230 = vmatpush1.bf16.msra.mxu0 %v1772_v13  ;;  %1578 = vmatprep.subr.bf16.mxu1 %v1788_v21 }
  0x14   :  { %231 = vmatprep.subr.bf16.mxu0 %v1773_v14 }
  0x16   :  { %1579 = vmatpush3.bf16.msra.mxu1 %v1788_v21 }
  0x17   :  { %232 = vmatpush1.bf16.msra.mxu0 %v1775_v16  ;;  %1580 = vmatprep.subr.bf16.mxu1 %v1789_v24 }
  0x18   :  { %233 = vmatprep.subr.bf16.mxu0 %v1776_v17 }
  0x1a   :  { %1581 = vmatpush3.bf16.msra.mxu1 %v1789_v24 }
  0x1b   :  { %234 = vmatpush1.bf16.msra.mxu0 %v1778_v18  ;;  %1582 = vmatprep.subr.bf16.mxu1 %v1790_v26 }
  0x1c   :  { %235 = vmatprep.subr.bf16.mxu0 %v1779_v20 }
  0x1e   :  { %1583 = vmatpush3.bf16.msra.mxu1 %v1790_v26 }
  0x1f   :  { %236 = vmatpush1.bf16.msra.mxu0 %v1781_v22  ;;  %1584 = vmatprep.subr.bf16.mxu1 %v1791_v27 }
  0x20   :  { %581 = vmatprep.subr.bf16.mxu0 %v2032_v23 }
  0x22   :  { %254 = vmatmul.mubr.bf16.vlgmr.msra.gmra.mrb[0].mxu0 %v1782_v9  ;;  %1585 = vmatpush3.bf16.msra.mxu1 %v1791_v27 }
  0x23   :  { %263 = vmatprep.mubr.bf16.mxu0 %v2623_v2  ;;  %582 = vmatpush1.bf16.msra.mxu0 %v2040_v25 }
  0x24   :  { %1590 = vmatprep.subr.bf16.mxu1 %v2625_v30 }
  0x25   :  { %1587 = vmatmul.mubr.bf16.vlgmr.msra.gmra.mrb[0].mxu1 %v1783_v28 }
  0x26   :  { %1591 = vmatpush3.bf16.msra.mxu1 %v2057_v29 }
  0x2a   :  { %264 = vmatmul.mubr.bf16.gmra.mrb[4].mxu0 %v1783_v28 }
  0x2b   :  { %613 = vmatprep.mubr.bf16.mxu0 %v2623_v2 }
  0x2c   :  { %12 = vsyncpa [#allocation3], 0  ;;  %1592 = vmatprep.subr.bf16.mxu1 %v2625_v30  ;;  %v2066_v31 = vld [vmem:[%s2618_s3 + $0x1c] ss:$12 sps:$4 sm:$0xff]   ;;  %v2071_v32 = vld [vmem:[%s2618_s3 + $0x18] ss:$12 sps:$4 sm:$0xff]   ;;  %v66_v53 = vlaneseq }
  0x2d   :  { %v2076_v33 = vld [vmem:[%s2618_s3 + $0x20] ss:$12 sps:$4 sm:$0xff]   ;;  %583 = vmatprep.subr.bf16.mxu0 %v2066_v31  ;;  %v2090_v35 = vld [vmem:[%s2618_s3 + $0x30] ss:$12 sps:$4 sm:$0xff]   ;;  %v2095_v36 = vld [vmem:[%s2618_s3 + $0x38] ss:$12 sps:$4 sm:$0xff]  }
  0x2e   :  { %584 = vmatpush1.bf16.msra.mxu0 %v2071_v32  ;;  %1593 = vmatpush3.bf16.msra.mxu1 %v2076_v33  ;;  %v2084_v34 = vld [vmem:[%s2618_s3 + $0x34] ss:$12 sps:$4 sm:$0xff]   ;;  %v2103_v37 = vld [vmem:[%s2618_s3 + $0x4c] ss:$12 sps:$4 sm:$0xff]   ;;  %v2114_v39 = vld [vmem:[%s2618_s3 + $0x50] ss:$12 sps:$4 sm:$0xff]  }
  0x2f   :  { %1594 = vmatprep.subr.bf16.mxu1 %v2625_v30  ;;  %585 = vmatprep.subr.bf16.mxu0 %v2084_v34  ;;  %v2109_v38 = vld [vmem:[%s2618_s3 + $0x48] ss:$12 sps:$4 sm:$0xff]   ;;  %v2122_v40 = vld [vmem:[%s2618_s3 + $0x64] ss:$12 sps:$4 sm:$0xff]   ;;  %v2128_v41 = vld [vmem:[%s2618_s3 + $0x60] ss:$12 sps:$4 sm:$0xff]  }
  0x30   :  { %v2133_v42 = vld [vmem:[%s2618_s3 + $0x68] ss:$12 sps:$4 sm:$0xff]   ;;  %v2147_v44 = vld [vmem:[%s2618_s3 + $0x78] ss:$12 sps:$4 sm:$0xff]   ;;  %v2152_v45 = vld [vmem:[%s2618_s3 + $0x80] ss:$12 sps:$4 sm:$0xff]  }
  0x31   :  { %v2141_v43 = vld [vmem:[%s2618_s3 + $0x7c] ss:$12 sps:$4 sm:$0xff]   ;;  %v2160_v46 = vld [vmem:[%s2618_s3 + $0x94] ss:$12 sps:$4 sm:$0xff]   ;;  %v2171_v48 = vld [vmem:[%s2618_s3 + $0x98] ss:$12 sps:$4 sm:$0xff]  }
  0x32   :  { %586 = vmatpush1.bf16.msra.mxu0 %v2090_v35  ;;  %1595 = vmatpush3.bf16.msra.mxu1 %v2095_v36  ;;  %v2166_v47 = vld [vmem:[%s2618_s3 + $0x90] ss:$12 sps:$4 sm:$0xff]   ;;  %v2179_v49 = vld [vmem:[%s2618_s3 + $0xac] ss:$12 sps:$4 sm:$0xff]   ;;  %v2185_v50 = vld [vmem:[%s2618_s3 + $0xa8] ss:$12 sps:$4 sm:$0xff]  }
  0x33   :  { %1596 = vmatprep.subr.bf16.mxu1 %v2625_v30  ;;  %587 = vmatprep.subr.bf16.mxu0 %v2103_v37  ;;  %v2190_v51 = vld [vmem:[%s2618_s3 + $0xb0] ss:$12 sps:$4 sm:$0xff]   ;;  %vm1920_vm0 = vmmov 0   ;;  %v67_v54 = vshrl.u32 %v66_v53, 7  ;;  %v64_v56 = vld [vmem:[%s2617_s2] sm:$0x7] }
  0x34   :  { %v2198_v52 = vld [vmem:[%s2618_s3 + $0xc4] ss:$12 sps:$4 sm:$0xff]   ;;  %1606 = vmatprep.mubr.msk.bf16.mxu1 %vm1920_vm0, %v2625_v30  ;;  %vm365_vm1 = vcmask 1040384   ;;  %s1921_s19 = smov [#allocation2]  }
  0x35   :  { %v2204_v55 = vsub.s32 0, %v67_v54  ;;  %v2209_v57 = vsub.s32 1, %v67_v54  ;;  %v2213_v7 = vsub.s32 2, %v67_v54  ;;  %s1399_s20 = sshll.u32 %s1921_s19, 4  ;;  %s1400_s20 = int_to_ptr.vmem [resolvable:$true] %s1399_s20 }
  0x36   :  { %588 = vmatpush1.bf16.msra.mxu0 %v2109_v38  ;;  %1597 = vmatpush3.bf16.msra.mxu1 %v2114_v39  ;;  %s1894_s21 = scalar_lea.vmem %s1400_s20, 32  ;;  %p1899_p1 = scmp.lt.s32.totalorder %s1400_s20, %s1400_s20 }
  0x37   :  { %1598 = vmatprep.subr.bf16.mxu1 %v2625_v30  ;;  %589 = vmatprep.subr.bf16.mxu0 %v2122_v40  ;;  %v69_v58 = vrot.slane %v64_v56, %v2204_v55  ;;  %v73_v60 = vrot.slane %v64_v56, %v2209_v57  ;;  %v77_v15 = vrot.slane %v64_v56, %v2213_v7  ;;  %p1895_p0 = scmp.ne.s32.totalorder %s1400_s20, %s1894_s21  ;;  %p1900_p2 = scmp.lt.s32.totalorder %s1894_s21, %s1894_s21 }
  0x39   :  { %p1901_p3 = por %p1900_p2, %p1899_p1 }
  0x3a   :  { %590 = vmatpush1.bf16.msra.mxu0 %v2128_v41  ;;  %1599 = vmatpush3.bf16.msra.mxu1 %v2133_v42 }
  0x3b   :  { %1600 = vmatprep.subr.bf16.mxu1 %v2625_v30  ;;  %591 = vmatprep.subr.bf16.mxu0 %v2141_v43  ;;  %p1902_p4 = pnand %p1901_p3, %p1895_p0 }
  0x3e   :  { %592 = vmatpush1.bf16.msra.mxu0 %v2147_v44  ;;  %1601 = vmatpush3.bf16.msra.mxu1 %v2152_v45 }
  0x3f   :  { %1602 = vmatprep.subr.bf16.mxu1 %v2625_v30  ;;  %593 = vmatprep.subr.bf16.mxu0 %v2160_v46 }
  0x42   :  { %594 = vmatpush1.bf16.msra.mxu0 %v2166_v47  ;;  %1603 = vmatpush3.bf16.msra.mxu1 %v2171_v48 }
  0x43   :  { %1604 = vmatprep.subr.bf16.mxu1 %v2625_v30  ;;  %595 = vmatprep.subr.bf16.mxu0 %v2179_v49 }
  0x46   :  { %596 = vmatpush1.bf16.msra.mxu0 %v2185_v50  ;;  %1605 = vmatpush3.bf16.msra.mxu1 %v2190_v51 }
  0x47   :  { %1610 = vmatprep.subr.bf16.mxu1 %v2625_v30  ;;  %806 = vmatprep.subr.bf16.mxu0 %v2198_v52 }
  0xf5   :  { %v255_v59 = vpop.f32.mrb[0].mxu0 }
  0xf6   :  { %v257_v61 = vpop.f32.mrb[1].mxu0  ;;  %v256_v63 = vadd.f32 %v255_v59, %v69_v58 }
  0xf7   :  { %v259_v62 = vpop.f32.mrb[2].mxu0  ;;  %v258_v3 = vadd.f32 %v257_v61, %v73_v60 }
  0xf8   :  { %v260_v0 = vadd.f32 %v259_v62, %v69_v58  ;;  %v261_v1 = vpop.f32.mrb[3].mxu0  ;;  %v1588_v24 = vpop.f32.mrb[0].mxu1 }
  0xf9   :  { %v262_v4 = vadd.f32 %v261_v1, %v73_v60  ;;  %v317_v28 = vadd.f32 %v1588_v24, %v77_v15  ;;  %v308_v53 = vpop.f32.mrb[1].mxu1  ;;  %v2234_v24 = vld [vmem:[%s2618_s3 + $0xdc] ss:$12 sps:$4 sm:$0xff]  }
  0xfa   :  { %v323_v5 = vmax.f32 %v256_v63, %v260_v0  ;;  %v309_v59 = vadd.f32 %v308_v53, %v77_v15  ;;  %v1589_v61 = vpop.f32.mrb[2].mxu1  ;;  %v2256_v53 = vld [vmem:[%s2618_s3 + $0xf4] ss:$12 sps:$4 sm:$0xff]  }
  0xfb   :  { %v330_v6 = vmax.f32 %v258_v3, %v262_v4  ;;  %v320_v63 = vadd.f32 %v1589_v61, %v77_v15  ;;  %v311_v0 = vpop.f32.mrb[3].mxu1  ;;  %v2278_v61 = vld [vmem:[%s2618_s3 + $0x10c] ss:$12 sps:$4 sm:$0xff]  }
  0xfc   :  { %v324_v8 = vrot.slane %v323_v5, 4  ;;  %v312_v3 = vadd.f32 %v311_v0, %v77_v15  ;;  %v2297_v0 = vld [vmem:[%s2618_s3 + $0x124] ss:$12 sps:$4 sm:$0xff]  }
  0xfd   :  { %v331_v9 = vrot.slane %v330_v6, 4  ;;  %v265_v10 = vpop.f32.mrb[4].mxu0 }
  0xfe   :  { %v325_v11 = vmax.f32 %v323_v5, %v324_v8  ;;  %v267_v12 = vpop.f32.mrb[5].mxu0  ;;  %v266_v16 = vadd.f32 %v265_v10, %v69_v58  ;;  %v2216_v5 = vmax.f32 %v317_v28, %v320_v63  ;;  %v2249_v28 = vld [vmem:[%s2618_s3 + $0xe0] ss:$12 sps:$4 sm:$0xff]   ;;  %v2290_v63 = vld [vmem:[%s2618_s3 + $0x110] ss:$12 sps:$4 sm:$0xff]  }
  0xff   :  { %v332_v13 = vmax.f32 %v330_v6, %v331_v9  ;;  %v269_v14 = vpop.f32.mrb[6].mxu0  ;;  %v268_v19 = vadd.f32 %v267_v12, %v73_v60  ;;  %v2218_v6 = vmax.f32 %v309_v59, %v312_v3  ;;  %v2271_v59 = vld [vmem:[%s2618_s3 + $0xf8] ss:$12 sps:$4 sm:$0xff]   ;;  %v2316_v3 = vld [vmem:[%s2618_s3 + $0x13c] ss:$12 sps:$4 sm:$0xff]  }
 0x100   :  { %v270_v17 = vadd.f32 %v269_v14, %v69_v58  ;;  %v271_v18 = vpop.f32.mrb[7].mxu0  ;;  %v326_v21 = vrot.slane %v325_v11, 2 }
 0x101   :  { %v272_v20 = vadd.f32 %v271_v18, %v73_v60  ;;  %v333_v26 = vrot.slane %v332_v13, 2 }
 0x102   :  { %v344_v22 = vmax.f32 %v266_v16, %v270_v17  ;;  %v327_v1 = vmax.f32 %v325_v11, %v326_v21  ;;  %v2229_v21 = vld [vmem:[%s2618_s3 + $0xc8] ss:$12 sps:$4 sm:$0xff]  }
 0x103   :  { %v351_v27 = vmax.f32 %v268_v19, %v272_v20  ;;  %v334_v58 = vmax.f32 %v332_v13, %v333_v26  ;;  %v2223_v13 = vld [vmem:[%s2618_s3 + $0xc0] ss:$12 sps:$4 sm:$0xff]  }
 0x104   :  { %v345_v54 = vrot.slane %v344_v22, 4  ;;  %v328_v9 = vrot.slane %v327_v1, 1 }
 0x105   :  { %v352_v62 = vrot.slane %v351_v27, 4  ;;  %v335_v12 = vrot.slane %v334_v58, 1 }
 0x106   :  { %v346_v56 = vmax.f32 %v344_v22, %v345_v54  ;;  %v329_v18 = vmax.f32 %v327_v1, %v328_v9  ;;  %v2266_v54 = vld [vmem:[%s2618_s3 + $0xf0] ss:$12 sps:$4 sm:$0xff]   ;;  %v2304_v1 = vld [vmem:[%s2618_s3 + $0x120] ss:$12 sps:$4 sm:$0xff]   ;;  %v2347_v9 = vld [vmem:[%s2618_s3 + $0x158] ss:$12 sps:$4 sm:$0xff]  }
 0x107   :  { %v353_v4 = vmax.f32 %v351_v27, %v352_v62  ;;  %v336_v11 = vmax.f32 %v334_v58, %v335_v12  ;;  %v2244_v27 = vld [vmem:[%s2618_s3 + $0xd8] ss:$12 sps:$4 sm:$0xff]   ;;  %v2285_v62 = vld [vmem:[%s2618_s3 + $0x108] ss:$12 sps:$4 sm:$0xff]   ;;  %2637 = vst [vmem:[#allocation8_spill] sm:$0xff] %v2347_v9 }
 0x108   :  { %v347_v60 = vrot.slane %v346_v56, 2  ;;  %v2323_v58 = vld [vmem:[%s2618_s3 + $0x138] ss:$12 sps:$4 sm:$0xff]   ;;  %v2361_v12 = vld [vmem:[%s2618_s3 + $0x168] ss:$12 sps:$4 sm:$0xff]  }
 0x109   :  { %v354_v8 = vrot.slane %v353_v4, 2  ;;  %2639 = vst [vmem:[#allocation10_spill] sm:$0xff] %v2361_v12 }
 0x10a   :  { %v348_v10 = vmax.f32 %v346_v56, %v347_v60  ;;  %v2309_v56 = vld [vmem:[%s2618_s3 + $0x128] ss:$12 sps:$4 sm:$0xff]  }
 0x10b   :  { %v355_v14 = vmax.f32 %v353_v4, %v354_v8  ;;  %v2328_v4 = vld [vmem:[%s2618_s3 + $0x140] ss:$12 sps:$4 sm:$0xff]   ;;  %v2342_v8 = vld [vmem:[%s2618_s3 + $0x150] ss:$12 sps:$4 sm:$0xff]  }
 0x10c   :  { %v349_v16 = vrot.slane %v348_v10, 1  ;;  %2634 = vst [vmem:[#allocation5_spill] sm:$0xff] %v2328_v4  ;;  %v2335_v60 = vld [vmem:[%s2618_s3 + $0x154] ss:$12 sps:$4 sm:$0xff]   ;;  %2636 = vst [vmem:[#allocation7_spill] sm:$0xff] %v2342_v8 }
 0x10d   :  { %v356_v17 = vrot.slane %v355_v14, 1  ;;  %2635 = vst [vmem:[#allocation6_spill] sm:$0xff] %v2335_v60 }
 0x10e   :  { %v350_v19 = vmax.f32 %v348_v10, %v349_v16  ;;  %v2354_v10 = vld [vmem:[%s2618_s3 + $0x16c] ss:$12 sps:$4 sm:$0xff]  }
 0x10f   :  { %v357_v20 = vmax.f32 %v355_v14, %v356_v17  ;;  %2638 = vst [vmem:[#allocation9_spill] sm:$0xff] %v2354_v10  ;;  %v2366_v14 = vld [vmem:[%s2618_s3 + $0x170] ss:$12 sps:$4 sm:$0xff]   ;;  %v359_v17 = vrot.slane %v2216_v5, 4 }
 0x110   :  { %v366_v15 = vsel %vm365_vm1, %v329_v18, %v350_v19  ;;  %2640 = vst [vmem:[#allocation11_spill] sm:$0xff] %v2366_v14  ;;  %v338_v18 = vrot.slane %v2218_v6, 4 }
 0x111   :  { %v436_v22 = vpack.c.bf16 %v366_v15, %v366_v15  ;;  %v2237_v26 = vsel %vm365_vm1, %v336_v11, %v357_v20  ;;  %v360_v19 = vmax.f32 %v2216_v5, %v359_v17 }
 0x112   :  { %v908_v16 = vpack.c.bf16 %v2237_v26, %v2237_v26  ;;  %v339_v11 = vmax.f32 %v2218_v6, %v338_v18 }
 0x113   :  { %614 = vmatmul.mubr.bf16.vlgmr.msra.gmra.mrb[8].mxu0 %v436_v22  ;;  %1607 = vmatmul.mubr.bf16.vlgmr.msra.gmra.mrb[4].mxu1 %v436_v22  ;;  %v361_v20 = vrot.slane %v360_v19, 2 }
 0x114   :  { %807 = vmatpush1.bf16.msra.mxu0 %v2223_v13  ;;  %1611 = vmatpush3.bf16.msra.mxu1 %v2229_v21  ;;  %v340_v15 = vrot.slane %v339_v11, 2 }
 0x115   :  { %808 = vmatprep.subr.bf16.mxu0 %v2234_v24  ;;  %1612 = vmatprep.subr.bf16.mxu1 %v2625_v30  ;;  %v362_v5 = vmax.f32 %v360_v19, %v361_v20 }
 0x116   :  { %838 = vmatprep.mubr.bf16.mxu0 %v2623_v2  ;;  %1626 = vmatprep.mubr.msk.bf16.mxu1 %vm1920_vm0, %v2625_v30  ;;  %v341_v6 = vmax.f32 %v339_v11, %v340_v15 }
 0x117   :  { %v363_v22 = vrot.slane %v362_v5, 1 }
 0x118   :  { %809 = vmatpush1.bf16.msra.mxu0 %v2244_v27  ;;  %1613 = vmatpush3.bf16.msra.mxu1 %v2249_v28  ;;  %v342_v26 = vrot.slane %v341_v6, 1 }
 0x119   :  { %810 = vmatprep.subr.bf16.mxu0 %v2256_v53  ;;  %1614 = vmatprep.subr.bf16.mxu1 %v2625_v30 }
 0x11a   :  { %v343_v17 = vmax.f32 %v341_v6, %v342_v26  ;;  %v433_v6 = vld [vmem:[%s2619_s4] ss:$2 sm:$0x7] }
 0x11c   :  { %811 = vmatpush1.bf16.msra.mxu0 %v2266_v54  ;;  %1615 = vmatpush3.bf16.msra.mxu1 %v2271_v59 }
 0x11d   :  { %812 = vmatprep.subr.bf16.mxu0 %v2278_v61  ;;  %1616 = vmatprep.subr.bf16.mxu1 %v2625_v30 }
 0x120   :  { %813 = vmatpush1.bf16.msra.mxu0 %v2285_v62  ;;  %1617 = vmatpush3.bf16.msra.mxu1 %v2290_v63 }
 0x121   :  { %814 = vmatprep.subr.bf16.mxu0 %v2297_v0  ;;  %1618 = vmatprep.subr.bf16.mxu1 %v2625_v30 }
 0x124   :  { %815 = vmatpush1.bf16.msra.mxu0 %v2304_v1  ;;  %1619 = vmatpush3.bf16.msra.mxu1 %v2309_v56 }
 0x125   :  { %816 = vmatprep.subr.bf16.mxu0 %v2316_v3  ;;  %1620 = vmatprep.subr.bf16.mxu1 %v2625_v30 }
 0x128   :  { %817 = vmatpush1.bf16.msra.mxu0 %v2323_v58  ;;  %1621 = vmatpush3.bf16.msra.mxu1 %v2328_v4 }
 0x129   :  { %818 = vmatprep.subr.bf16.mxu0 %v2335_v60  ;;  %1622 = vmatprep.subr.bf16.mxu1 %v2625_v30 }
 0x12c   :  { %819 = vmatpush1.bf16.msra.mxu0 %v2342_v8  ;;  %1623 = vmatpush3.bf16.msra.mxu1 %v2347_v9 }
 0x12d   :  { %820 = vmatprep.subr.bf16.mxu0 %v2354_v10  ;;  %1624 = vmatprep.subr.bf16.mxu1 %v2625_v30 }
 0x130   :  { %821 = vmatpush1.bf16.msra.mxu0 %v2361_v12  ;;  %1625 = vmatpush3.bf16.msra.mxu1 %v2366_v14 }
 0x131   :  { %909 = vmatprep.subr.bf16.mxu0 %v2032_v23  ;;  %1630 = vmatprep.subr.bf16.mxu1 %v2625_v30 }
 0x133   :  { %839 = vmatmul.mubr.bf16.vlgmr.msra.gmra.mrb[8].mxu0 %v2623_v2  ;;  %1627 = vmatmul.mubr.bf16.vlgmr.msra.gmra.mrb[8].mxu1 %v2623_v2 }
 0x134   :  { %910 = vmatpush1.bf16.msra.mxu0 %v2040_v25  ;;  %1631 = vmatpush3.bf16.msra.mxu1 %v2057_v29 }
 0x135   :  { %911 = vmatprep.subr.bf16.mxu0 %v2066_v31  ;;  %1632 = vmatprep.subr.bf16.mxu1 %v2625_v30 }
 0x136   :  { %941 = vmatprep.mubr.bf16.mxu0 %v2623_v2  ;;  %1646 = vmatprep.mubr.msk.bf16.mxu1 %vm1920_vm0, %v2625_v30 }
 0x138   :  { %912 = vmatpush1.bf16.msra.mxu0 %v2071_v32  ;;  %1633 = vmatpush3.bf16.msra.mxu1 %v2076_v33 }
 0x139   :  { %913 = vmatprep.subr.bf16.mxu0 %v2084_v34  ;;  %1634 = vmatprep.subr.bf16.mxu1 %v2625_v30 }
 0x13c   :  { %914 = vmatpush1.bf16.msra.mxu0 %v2090_v35  ;;  %1635 = vmatpush3.bf16.msra.mxu1 %v2095_v36 }
 0x13d   :  { %915 = vmatprep.subr.bf16.mxu0 %v2103_v37  ;;  %1636 = vmatprep.subr.bf16.mxu1 %v2625_v30 }
 0x140   :  { %916 = vmatpush1.bf16.msra.mxu0 %v2109_v38  ;;  %1637 = vmatpush3.bf16.msra.mxu1 %v2114_v39 }
 0x141   :  { %917 = vmatprep.subr.bf16.mxu0 %v2122_v40  ;;  %1638 = vmatprep.subr.bf16.mxu1 %v2625_v30 }
 0x144   :  { %918 = vmatpush1.bf16.msra.mxu0 %v2128_v41  ;;  %1639 = vmatpush3.bf16.msra.mxu1 %v2133_v42 }
 0x145   :  { %919 = vmatprep.subr.bf16.mxu0 %v2141_v43  ;;  %1640 = vmatprep.subr.bf16.mxu1 %v2625_v30 }
 0x148   :  { %920 = vmatpush1.bf16.msra.mxu0 %v2147_v44  ;;  %1641 = vmatpush3.bf16.msra.mxu1 %v2152_v45 }
 0x149   :  { %921 = vmatprep.subr.bf16.mxu0 %v2160_v46  ;;  %1642 = vmatprep.subr.bf16.mxu1 %v2625_v30 }
 0x14c   :  { %922 = vmatpush1.bf16.msra.mxu0 %v2166_v47  ;;  %1643 = vmatpush3.bf16.msra.mxu1 %v2171_v48 }
 0x14d   :  { %923 = vmatprep.subr.bf16.mxu0 %v2179_v49  ;;  %1644 = vmatprep.subr.bf16.mxu1 %v2625_v30 }
 0x150   :  { %924 = vmatpush1.bf16.msra.mxu0 %v2185_v50  ;;  %1645 = vmatpush3.bf16.msra.mxu1 %v2190_v51 }
 0x151   :  { %991 = vmatprep.subr.bf16.mxu0 %v2198_v52  ;;  %1650 = vmatprep.subr.bf16.mxu1 %v2625_v30 }
 0x153   :  { %942 = vmatmul.mubr.bf16.vlgmr.msra.gmra.mrb[12].mxu0 %v908_v16  ;;  %1647 = vmatmul.mubr.bf16.vlgmr.msra.gmra.mrb[12].mxu1 %v908_v16  ;;  %v364_v16 = vmax.f32 %v362_v5, %v363_v22  ;;  %v1433_v5 = vld [vmem:[%s2619_s4 + $0x1] ss:$2 sm:$0x7]  ;;  %v441_v22 = vrot.slane %v433_v6, %v2204_v55 }
 0x154   :  { %992 = vmatpush1.bf16.msra.mxu0 %v2223_v13  ;;  %1651 = vmatpush3.bf16.msra.mxu1 %v2229_v21  ;;  %v666_v26 = vrot.slane %v1433_v5, %v2204_v55 }
 0x155   :  { %993 = vmatprep.subr.bf16.mxu0 %v2234_v24  ;;  %1652 = vmatprep.subr.bf16.mxu1 %v2625_v30  ;;  %v2449_v18 = vsel %vm365_vm1, %v343_v17, %v364_v16  ;;  %v670_v16 = vrot.slane %v1433_v5, %v2209_v57 }
 0x156   :  { %1023 = vmatprep.mubr.bf16.mxu0 %v2623_v2  ;;  %1666 = vmatprep.mubr.msk.bf16.mxu1 %vm1920_vm0, %v2625_v30  ;;  %v2465_v17 = vadd.f32 %v666_v26, %v441_v22  ;;  %v2472_v26 = vrot.slane %v1433_v5, %v2213_v7 }
 0x158   :  { %994 = vmatpush1.bf16.msra.mxu0 %v2244_v27  ;;  %1653 = vmatpush3.bf16.msra.mxu1 %v2249_v28 }
 0x159   :  { %995 = vmatprep.subr.bf16.mxu0 %v2256_v53  ;;  %1654 = vmatprep.subr.bf16.mxu1 %v2625_v30 }
 0x15c   :  { %996 = vmatpush1.bf16.msra.mxu0 %v2266_v54  ;;  %1655 = vmatpush3.bf16.msra.mxu1 %v2271_v59 }
 0x15d   :  { %997 = vmatprep.subr.bf16.mxu0 %v2278_v61  ;;  %1656 = vmatprep.subr.bf16.mxu1 %v2625_v30 }
 0x160   :  { %998 = vmatpush1.bf16.msra.mxu0 %v2285_v62  ;;  %1657 = vmatpush3.bf16.msra.mxu1 %v2290_v63 }
 0x161   :  { %999 = vmatprep.subr.bf16.mxu0 %v2297_v0  ;;  %1658 = vmatprep.subr.bf16.mxu1 %v2625_v30 }
 0x164   :  { %1000 = vmatpush1.bf16.msra.mxu0 %v2304_v1  ;;  %1659 = vmatpush3.bf16.msra.mxu1 %v2309_v56 }
 0x165   :  { %1001 = vmatprep.subr.bf16.mxu0 %v2316_v3  ;;  %1660 = vmatprep.subr.bf16.mxu1 %v2625_v30 }
 0x168   :  { %1002 = vmatpush1.bf16.msra.mxu0 %v2323_v58  ;;  %1661 = vmatpush3.bf16.msra.mxu1 %v2328_v4 }
 0x169   :  { %1003 = vmatprep.subr.bf16.mxu0 %v2335_v60  ;;  %1662 = vmatprep.subr.bf16.mxu1 %v2625_v30 }
 0x16c   :  { %1004 = vmatpush1.bf16.msra.mxu0 %v2342_v8  ;;  %1663 = vmatpush3.bf16.msra.mxu1 %v2347_v9 }
 0x16d   :  { %1005 = vmatprep.subr.bf16.mxu0 %v2354_v10  ;;  %1664 = vmatprep.subr.bf16.mxu1 %v2625_v30 }
 0x170   :  { %1006 = vmatpush1.bf16.msra.mxu0 %v2361_v12  ;;  %1665 = vmatpush3.bf16.msra.mxu1 %v2366_v14 }
 0x171   :  { %1095 = vmatprep.subr.bf16.mxu0 %v2032_v23  ;;  %1670 = vmatprep.subr.bf16.mxu1 %v2625_v30  ;;  %v445_v23 = vrot.slane %v433_v6, %v2209_v57 }
 0x1e6   :  { %v656_v19 = vpop.f32.mrb[4].mxu1 }
 0x1e7   :  { %v1608_v11 = vpop.f32.mrb[5].mxu1 }
 0x1e8   :  { %v659_v20 = vpop.f32.mrb[6].mxu1 }
 0x1e9   :  { %v1609_v15 = vpop.f32.mrb[7].mxu1  ;;  %v2467_v20 = vadd.f32 %v670_v16, %v445_v23  ;;  %v2475_v16 = vrot.slane %v433_v6, %v2213_v7 }
 0x206   :  { %v840_v11 = vpop.f32.mrb[8].mxu0  ;;  %v881_v15 = vpop.f32.mrb[8].mxu1 }
 0x207   :  { %v1731_v2 = vadd.f32 %v2465_v17, %v840_v11  ;;  %v842_v30 = vpop.f32.mrb[9].mxu0  ;;  %v1628_v14 = vpop.f32.mrb[9].mxu1 }
 0x208   :  { %v844_v12 = vpop.f32.mrb[10].mxu0  ;;  %v884_v10 = vpop.f32.mrb[10].mxu1  ;;  %v1733_v55 = vadd.f32 %v2467_v20, %v842_v30 }
 0x209   :  { %v1482_v9 = vmul.f32 -1.442695, %v1731_v2  ;;  %v845_v8 = vpop.f32.mrb[11].mxu0  ;;  %v1629_v60 = vpop.f32.mrb[11].mxu1  ;;  %v882_v2 = vadd.f32 %v881_v15, %v2472_v26 }
 0x20a   :  { %v1483_v4 = vmul.f32 -1.442695, %v1733_v55  ;;  %v657_v60 = vadd.f32 %v656_v19, %v2475_v16  ;;  %v2641_v19 = vmov 0.0  }
 0x20b   :  { %1864 = vpow2.f32 %v1482_v9 }
 0x20c   :  { %1866 = vpow2.f32 %v1483_v4 }
 0x215   :  { %v1865_v57 = vpop.eup %1864 }
 0x216   :  { %v891_v22 = vadd.f32 1.0, %v1865_v57  ;;  %v1867_v23 = vpop.eup %1866 }
 0x217   :  { %v898_v12 = vadd.f32 1.0, %v1867_v23  ;;  %v2642_v23 = vmov 0  }
 0x218   :  { %1868 = vrcp.f32 %v891_v22 }
 0x219   :  { %1870 = vrcp.f32 %v898_v12  ;;  %v1857_v12 = vld [vmem:[%s2620_s5 + $0x8] sm:$0xff]  }
 0x222   :  { %v1869_v8 = vpop.eup %1868 }
 0x223   :  { %v901_v30 = vmul.f32 %v1869_v8, %v882_v2  ;;  %v1871_v11 = vpop.eup %1870  ;;  %v1858_v2 = vld [vmem:[%s2620_s5 + $0x10] sm:$0xff]   ;;  %v1859_v8 = vld [vmem:[%s2620_s5 + $0x18] sm:$0xff]  }
 0x224   :  { %v904_v55 = vsub.f32 1.0, %v1871_v11  ;;  %v906_v6 = vmul.f32 0.0, %v1871_v11 }
 0x225   :  { %v902_v9 = vadd.f32 %v901_v30, %v657_v60  ;;  %v1860_v60 = vld [vmem:[%s2620_s5 + $0x20] sm:$0xff]   ;;  %v1861_v30 = vld [vmem:[%s2620_s5 + $0x28] sm:$0xff]  }
 0x226   :  { %v2479_v4 = vpop.f32.mrb[12].mxu1 }
 0x227   :  { %1872 = vtanh.f32 %v902_v9  ;;  %v1648_v10 = vpop.f32.mrb[13].mxu1  ;;  %v1862_v9 = vld [vmem:[%s2620_s5 + $0x30] sm:$0xff]  }
 0x228   :  { %v987_v14 = vpop.f32.mrb[14].mxu1 }
 0x229   :  { %v1649_v5 = vpop.f32.mrb[15].mxu1 }
 0x231   :  { %v1873_v57 = vpop.eup %1872 }
 0x232   :  { %v905_v7 = vmul.f32 %v1873_v57, %v904_v55 }
 0x234   :  { %v2481_v22 = vadd.f32 %v906_v6, %v905_v7 }
 0x236   :  { %v990_v15 = vpack.c.bf16 %v2481_v22, %v2481_v22 }
 0x238   :  { %1024 = vmatmul.mubr.bf16.vlgmr.msra.gmra.mrb[12].mxu0 %v990_v15  ;;  %1667 = vmatmul.mubr.bf16.vlgmr.msra.gmra.mrb[16].mxu1 %v990_v15 }
 0x239   :  { %1096 = vmatpush1.bf16.msra.mxu0 %v2040_v25  ;;  %1671 = vmatpush3.bf16.msra.mxu1 %v2057_v29  ;;  %v1094_v25 = vpack.c.bf16 %v2449_v18, %v2449_v18  ;;  %v2643_v29 = vld [vmem:[#allocation5_spill] sm:$0xff] }
 0x23a   :  { %1097 = vmatprep.subr.bf16.mxu0 %v2066_v31  ;;  %1672 = vmatprep.subr.bf16.mxu1 %v2641_v19  ;;  %v2644_v31 = vld [vmem:[#allocation6_spill] sm:$0xff]  ;;  %v1856_v18 = vld [vmem:[%s2620_s5] sm:$0xff]  }
 0x23b   :  { %1127 = vmatprep.mubr.bf16.mxu0 %v2642_v23  ;;  %1686 = vmatprep.mubr.msk.bf16.mxu1 %vm1920_vm0, %v2641_v19 }
 0x23d   :  { %1098 = vmatpush1.bf16.msra.mxu0 %v2071_v32  ;;  %1673 = vmatpush3.bf16.msra.mxu1 %v2076_v33  ;;  %v2645_v32 = vld [vmem:[#allocation7_spill] sm:$0xff]  ;;  %v2646_v33 = vld [vmem:[#allocation8_spill] sm:$0xff] }
 0x23e   :  { %1099 = vmatprep.subr.bf16.mxu0 %v2084_v34  ;;  %1674 = vmatprep.subr.bf16.mxu1 %v2641_v19  ;;  %v2647_v34 = vld [vmem:[#allocation9_spill] sm:$0xff] }
 0x241   :  { %1100 = vmatpush1.bf16.msra.mxu0 %v2090_v35  ;;  %1675 = vmatpush3.bf16.msra.mxu1 %v2095_v36  ;;  %v2648_v35 = vld [vmem:[#allocation10_spill] sm:$0xff]  ;;  %v2649_v36 = vld [vmem:[#allocation11_spill] sm:$0xff] }
 0x242   :  { %1101 = vmatprep.subr.bf16.mxu0 %v2103_v37  ;;  %1676 = vmatprep.subr.bf16.mxu1 %v2641_v19 }
 0x245   :  { %1102 = vmatpush1.bf16.msra.mxu0 %v2109_v38  ;;  %1677 = vmatpush3.bf16.msra.mxu1 %v2114_v39 }
 0x246   :  { %1103 = vmatprep.subr.bf16.mxu0 %v2122_v40  ;;  %1678 = vmatprep.subr.bf16.mxu1 %v2641_v19 }
 0x249   :  { %1104 = vmatpush1.bf16.msra.mxu0 %v2128_v41  ;;  %1679 = vmatpush3.bf16.msra.mxu1 %v2133_v42 }
 0x24a   :  { %1105 = vmatprep.subr.bf16.mxu0 %v2141_v43  ;;  %1680 = vmatprep.subr.bf16.mxu1 %v2641_v19 }
 0x24d   :  { %1106 = vmatpush1.bf16.msra.mxu0 %v2147_v44  ;;  %1681 = vmatpush3.bf16.msra.mxu1 %v2152_v45 }
 0x24e   :  { %1107 = vmatprep.subr.bf16.mxu0 %v2160_v46  ;;  %1682 = vmatprep.subr.bf16.mxu1 %v2641_v19 }
 0x251   :  { %1108 = vmatpush1.bf16.msra.mxu0 %v2166_v47  ;;  %1683 = vmatpush3.bf16.msra.mxu1 %v2171_v48 }
 0x252   :  { %1109 = vmatprep.subr.bf16.mxu0 %v2179_v49  ;;  %1684 = vmatprep.subr.bf16.mxu1 %v2641_v19 }
 0x255   :  { %1110 = vmatpush1.bf16.msra.mxu0 %v2185_v50  ;;  %1685 = vmatpush3.bf16.msra.mxu1 %v2190_v51 }
 0x256   :  { %1177 = vmatprep.subr.bf16.mxu0 %v2198_v52  ;;  %1690 = vmatprep.subr.bf16.mxu1 %v2641_v19 }
 0x258   :  { %1128 = vmatmul.mubr.bf16.vlgmr.msra.gmra.mrb[16].mxu0 %v1094_v25  ;;  %1687 = vmatmul.mubr.bf16.vlgmr.msra.gmra.mrb[20].mxu1 %v1094_v25 }
 0x259   :  { %1178 = vmatpush1.bf16.msra.mxu0 %v2223_v13  ;;  %1691 = vmatpush3.bf16.msra.mxu1 %v2229_v21 }
 0x25a   :  { %1179 = vmatprep.subr.bf16.mxu0 %v2234_v24  ;;  %1692 = vmatprep.subr.bf16.mxu1 %v2641_v19  ;;  %v985_v24 = vadd.f32 %v2479_v4, %v2475_v16  ;;  %v1863_v4 = vld [vmem:[%s2620_s5 + $0x38] sm:$0xff]  }
 0x25b   :  { %1209 = vmatprep.mubr.bf16.mxu0 %v2642_v23  ;;  %1706 = vmatprep.mubr.msk.bf16.mxu1 %vm1920_vm0, %v2641_v19 }
 0x25d   :  { %1180 = vmatpush1.bf16.msra.mxu0 %v2244_v27  ;;  %1693 = vmatpush3.bf16.msra.mxu1 %v2249_v28 }
 0x25e   :  { %1181 = vmatprep.subr.bf16.mxu0 %v2256_v53  ;;  %1694 = vmatprep.subr.bf16.mxu1 %v2641_v19 }
 0x261   :  { %1182 = vmatpush1.bf16.msra.mxu0 %v2266_v54  ;;  %1695 = vmatpush3.bf16.msra.mxu1 %v2271_v59 }
 0x262   :  { %1183 = vmatprep.subr.bf16.mxu0 %v2278_v61  ;;  %1696 = vmatprep.subr.bf16.mxu1 %v2641_v19 }
 0x265   :  { %1184 = vmatpush1.bf16.msra.mxu0 %v2285_v62  ;;  %1697 = vmatpush3.bf16.msra.mxu1 %v2290_v63 }
 0x266   :  { %1185 = vmatprep.subr.bf16.mxu0 %v2297_v0  ;;  %1698 = vmatprep.subr.bf16.mxu1 %v2641_v19 }
 0x269   :  { %1186 = vmatpush1.bf16.msra.mxu0 %v2304_v1  ;;  %1699 = vmatpush3.bf16.msra.mxu1 %v2309_v56 }
 0x26a   :  { %1187 = vmatprep.subr.bf16.mxu0 %v2316_v3  ;;  %1700 = vmatprep.subr.bf16.mxu1 %v2641_v19 }
 0x26d   :  { %1188 = vmatpush1.bf16.msra.mxu0 %v2323_v58  ;;  %1701 = vmatpush3.bf16.msra.mxu1 %v2643_v29 }
 0x26e   :  { %1189 = vmatprep.subr.bf16.mxu0 %v2644_v31  ;;  %1702 = vmatprep.subr.bf16.mxu1 %v2641_v19 }
 0x271   :  { %1190 = vmatpush1.bf16.msra.mxu0 %v2645_v32  ;;  %1703 = vmatpush3.bf16.msra.mxu1 %v2646_v33 }
 0x272   :  { %1191 = vmatprep.subr.bf16.mxu0 %v2647_v34  ;;  %1704 = vmatprep.subr.bf16.mxu1 %v2641_v19 }
 0x275   :  { %1192 = vmatpush1.bf16.msra.mxu0 %v2648_v35  ;;  %1705 = vmatpush3.bf16.msra.mxu1 %v2649_v36 }
 0x276   :  { %1710 = vmatprep.subr.bf16.mxu0 %v2641_v19 }
 0x30b   :  { %v1025_v37 = vpop.f32.mrb[12].mxu0  ;;  %v1066_v38 = vpop.f32.mrb[16].mxu1 }
 0x30c   :  { %v1735_v39 = vadd.f32 %v2465_v17, %v1025_v37  ;;  %v1027_v40 = vpop.f32.mrb[13].mxu0  ;;  %v1668_v41 = vpop.f32.mrb[17].mxu1  ;;  %v1067_v13 = vadd.f32 %v1066_v38, %v2472_v26 }
 0x30d   :  { %v1029_v42 = vpop.f32.mrb[14].mxu0  ;;  %v1069_v43 = vpop.f32.mrb[18].mxu1  ;;  %v1737_v47 = vadd.f32 %v2467_v20, %v1027_v40 }
 0x30e   :  { %v1484_v44 = vmul.f32 -1.442695, %v1735_v39  ;;  %v1030_v45 = vpop.f32.mrb[15].mxu0  ;;  %v1669_v46 = vpop.f32.mrb[19].mxu1 }
 0x30f   :  { %v1485_v48 = vmul.f32 -1.442695, %v1737_v47 }
 0x310   :  { %1874 = vpow2.f32 %v1484_v44 }
 0x311   :  { %1876 = vpow2.f32 %v1485_v48 }
 0x31a   :  { %v1875_v49 = vpop.eup %1874 }
 0x31b   :  { %v1076_v50 = vadd.f32 1.0, %v1875_v49  ;;  %v1877_v51 = vpop.eup %1876 }
 0x31c   :  { %v1083_v52 = vadd.f32 1.0, %v1877_v51 }
 0x31d   :  { %1878 = vrcp.f32 %v1076_v50 }
 0x31e   :  { %1880 = vrcp.f32 %v1083_v52 }
 0x327   :  { %v1879_v21 = vpop.eup %1878 }
 0x328   :  { %v1086_v27 = vmul.f32 %v1879_v21, %v1067_v13  ;;  %v1881_v62 = vpop.eup %1880 }
 0x329   :  { %v1089_v63 = vsub.f32 1.0, %v1881_v62  ;;  %v1091_v56 = vmul.f32 %v1881_v62, %v2481_v22 }
 0x32a   :  { %v1087_v28 = vadd.f32 %v1086_v27, %v985_v24 }
 0x32b   :  { %v1170_v53 = vpop.f32.mrb[20].mxu1 }
 0x32c   :  { %1882 = vtanh.f32 %v1087_v28  ;;  %v1688_v54 = vpop.f32.mrb[21].mxu1  ;;  %v1171_v35 = vadd.f32 %v1170_v53, %v2475_v16 }
 0x32d   :  { %v1173_v59 = vpop.f32.mrb[22].mxu1 }
 0x32e   :  { %v1689_v61 = vpop.f32.mrb[23].mxu1 }
 0x336   :  { %v1883_v0 = vpop.eup %1882 }
 0x337   :  { %v1090_v1 = vmul.f32 %v1883_v0, %v1089_v63 }
 0x339   :  { %v1092_v3 = vadd.f32 %v1091_v56, %v1090_v1 }
 0x33b   :  { %v1176_v58 = vpack.c.bf16 %v1092_v3, %v1092_v3  ;;  %v1093_v42 = vmax.f32 %v2481_v22, %v1092_v3 }
 0x33d   :  { %1210 = vmatmul.mubr.bf16.vlgmr.msra.gmra.mrb[16].mxu0 %v1176_v58  ;;  %1707 = vmatmul.mubr.bf16.vlgmr.msra.gmra.mrb[24].mxu1 %v1176_v58 }
 0x33e   :  { %1726 = vmatprep.mubr.msk.bf16.mxu0 %vm1920_vm0, %v2641_v19  ;;  %1711 = vmatpush3.bf16.msra.mxu0 %v1856_v18 }
 0x33f   :  { %1712 = vmatprep.subr.bf16.mxu0 %v2641_v19 }
 0x342   :  { %1713 = vmatpush3.bf16.msra.mxu0 %v1857_v12 }
 0x343   :  { %1714 = vmatprep.subr.bf16.mxu0 %v2641_v19 }
 0x346   :  { %1715 = vmatpush3.bf16.msra.mxu0 %v1858_v2 }
 0x347   :  { %1716 = vmatprep.subr.bf16.mxu0 %v2641_v19 }
 0x34a   :  { %1717 = vmatpush3.bf16.msra.mxu0 %v1859_v8 }
 0x34b   :  { %1718 = vmatprep.subr.bf16.mxu0 %v2641_v19 }
 0x34e   :  { %1719 = vmatpush3.bf16.msra.mxu0 %v1860_v60 }
 0x34f   :  { %1720 = vmatprep.subr.bf16.mxu0 %v2641_v19 }
 0x352   :  { %1721 = vmatpush3.bf16.msra.mxu0 %v1861_v30 }
 0x353   :  { %1722 = vmatprep.subr.bf16.mxu0 %v2641_v19 }
 0x356   :  { %1723 = vmatpush3.bf16.msra.mxu0 %v1862_v9 }
 0x357   :  { %1724 = vmatprep.subr.bf16.mxu0 %v2641_v19 }
 0x35a   :  { %1725 = vmatpush3.bf16.msra.mxu0 %v1863_v4 }
 0x410   :  { %v1211_v10 = vpop.f32.mrb[16].mxu0  ;;  %v1252_v14 = vpop.f32.mrb[24].mxu1 }
 0x411   :  { %v1739_v5 = vadd.f32 %v2465_v17, %v1211_v10  ;;  %v1213_v11 = vpop.f32.mrb[17].mxu0  ;;  %v1708_v55 = vpop.f32.mrb[25].mxu1  ;;  %v1253_v34 = vadd.f32 %v1252_v14, %v2472_v26  ;;  %v1488_v26 = vld [vmem:[%s2621_s6] ss:$0 sm:$0xff] }
 0x412   :  { %v1215_v57 = vpop.f32.mrb[18].mxu0  ;;  %v1255_v7 = vpop.f32.mrb[26].mxu1  ;;  %v1741_v25 = vadd.f32 %v2467_v20, %v1213_v11 }
 0x413   :  { %v1486_v6 = vmul.f32 -1.442695, %v1739_v5  ;;  %v1216_v15 = vpop.f32.mrb[19].mxu0  ;;  %v1709_v23 = vpop.f32.mrb[27].mxu1 }
 0x414   :  { %v1487_v29 = vmul.f32 -1.442695, %v1741_v25 }
 0x415   :  { %1884 = vpow2.f32 %v1486_v6 }
 0x416   :  { %1886 = vpow2.f32 %v1487_v29 }
 0x41f   :  { %v1885_v31 = vpop.eup %1884 }
 0x420   :  { %v1262_v32 = vadd.f32 1.0, %v1885_v31  ;;  %v1887_v19 = vpop.eup %1886 }
 0x421   :  { %v1269_v33 = vadd.f32 1.0, %v1887_v19 }
 0x422   :  { %1888 = vrcp.f32 %v1262_v32 }
 0x423   :  { %1890 = vrcp.f32 %v1269_v33 }
 0x42c   :  { %v1889_v17 = vpop.eup %1888 }
 0x42d   :  { %v1272_v36 = vmul.f32 %v1889_v17, %v1253_v34  ;;  %v1891_v38 = vpop.eup %1890 }
 0x42e   :  { %v1275_v39 = vsub.f32 1.0, %v1891_v38  ;;  %v1277_v41 = vmul.f32 %v1891_v38, %v1092_v3 }
 0x42f   :  { %v1273_v37 = vadd.f32 %v1272_v36, %v1171_v35 }
 0x431   :  { %1892 = vtanh.f32 %v1273_v37 }
 0x43b   :  { %v1893_v20 = vpop.eup %1892 }
 0x43c   :  { %v1276_v40 = vmul.f32 %v1893_v20, %v1275_v39 }
 0x43e   :  { %v1278_v43 = vadd.f32 %v1277_v41, %v1276_v40 }
 0x440   :  { %v1279_v44 = vmax.f32 %v1093_v42, %v1278_v43 }
 0x442   :  { %v1280_v45 = vpack.c.bf16 %v1279_v44, %v1279_v44 }
 0x444   :  { %1727 = vmatmul.mubr.bf16.vlgmr.msra.gmra.mrb[20].mxu0 %v1280_v45 }
 0x517   :  { %v1386_v16 = vpop.f32.mrb[20].mxu0 }
 0x518   :  { %v1387_v46 = vadd.f32 %v1488_v26, %v1386_v16  ;;  %v1728_v47 = vpop.f32.mrb[21].mxu0 }
 0x519   :  { %v1389_v48 = vpop.f32.mrb[22].mxu0 }
 0x51a   :  { %1392 = vst [vmem:[#allocation2] sm:$0x3] %v1387_v46  ;;  %v1729_v49 = vpop.f32.mrb[23].mxu0 }
 0x51b   :  { %1905 = shalt.err (!%p1902_p4)
}
 0x51c   :  { %s1906_s6 = scalar_lea.hbm %s2622_s7, 32 }
 0x51d   :  { %p1907_p5 = scmp.ne.s32.totalorder %s2622_s7, %s1906_s6  ;;  %p1910_p6 = scmp.lt.u32.totalorder %s1906_s6, %s2622_s7 }
 0x51f   :  { %p1912_p7 = pnand %p1910_p6, %p1907_p5 }
 0x521   :  { %1915 = shalt.err (!%p1912_p7)
}
 0x522   :  { %1402 = dma.vmem_to_hbm [thread:$0]  %s1400_s20, 32, %s2622_s7, [#allocation3]  }
 0x523   :  { %1916 = dma.done.wait [#allocation3], 32  }
 0x524   :  { %1917 = vsyncadd [#allocation3], 4294967264 }
 0x525   :  { %1406 = vsyncpa [#allocation3], 1 }

</bundles_post_ra>
